<compile_context>
chip_gen: v7x
topology: tpu7x:2x2x1
jax: 0.10.0
libtpu: 0.0.40
codegen_flags: <defaults>
</compile_context>

<pallas_src>
import numpy as np
import jax
import jax.numpy as jnp
from jax.experimental import pallas as pl
from jax.experimental.pallas import tpu as pltpu


LANE = 128     # vreg lane width: feature dims padded to this
SUBLANE = 8    # vreg sublane width: row-ish dims padded to this


def _round_up(x, m):
    return ((x + m - 1) // m) * m


def _adaptive_avg_pool_matrix(length, target):
    """P [target, length] s.t. P @ y == AdaptiveAvgPool1d(target) over the seq axis."""
    mat = np.zeros((target, length), dtype=np.float32)
    for i in range(target):
        start = (i * length) // target
        end = -(-((i + 1) * length) // target)  # ceil div
        mat[i, start:end] = 1.0 / (end - start)
    return mat


# ---------------------------------------------------------------------------
# Pallas kernel: fused (Linear1 + pos/bias + ReLU -> adaptive-pool -> Linear2)
# on a flattened [rows, features] slab of whole batch elements.
# ---------------------------------------------------------------------------
def _projector_kernel(x_ref, posb_ref, w1_ref, pool_ref, w2_ref, b2_ref, o_ref):
    # x_ref:    (RM, D_in_p)   RM = batches_per_step * S_pad flattened rows
    # posb_ref: (RM, D_h_p)    precomputed (pos @ W1 + b1), tiled per batch element
    # w1_ref:   (D_in_p, D_h_p)
    # pool_ref: (RT, RM)       block-diagonal adaptive-avg-pool matrix
    # w2_ref:   (D_h_p, D_out_p)   b2_ref: (1, D_out_p)
    # o_ref:    (RT, D_out_p)  RT = batches_per_step * T_pad flattened pooled rows
    h = jnp.dot(x_ref[...], w1_ref[...], preferred_element_type=jnp.float32)    # [RM, D_h_p]
    h = jnp.maximum(h + posb_ref[...], 0.0)                                      # pos + b1 + ReLU
    # Pool BEFORE the second linear (exact: pooling is linear, rows sum to 1).
    ph = jnp.dot(pool_ref[...], h, preferred_element_type=jnp.float32)           # [RT, D_h_p]
    y = jnp.dot(ph, w2_ref[...], preferred_element_type=jnp.float32)             # [RT, D_out_p]
    y = y + b2_ref[...]
    o_ref[...] = y.astype(o_ref.dtype)                                           # lane-dense store


def audio_modality_projector(x, pos_encoding, w1, b1, w2, b2, target_length,
                             row_budget=512):
    """x: [B, S, D_in] -> [B, target_length, D_out] (eval-mode forward)."""
    B, S, D_in = x.shape
    D_h = w1.shape[1]
    D_out = w2.shape[1]
    T = target_length
    dtype = x.dtype

    # --- padding: features -> 128 lanes, seq/target rows -> 8 sublanes -----------
    D_in_p = _round_up(D_in, LANE)
    D_h_p = _round_up(D_h, LANE)
    D_out_p = _round_up(D_out, LANE)
    S_p = _round_up(S, SUBLANE)
    T_p = _round_up(T, SUBLANE)

    # --- how many whole batch elements to fuse per grid step ---------------------
    # Largest divisor of B whose flattened row count fits the row budget; at the
    # toy size this is B itself -> a single grid step.
    bb = 1
    for cand in range(B, 0, -1):
        if B % cand == 0 and cand * S_p <= max(S_p, row_budget):
            bb = cand
            break
    G = B // bb          # grid steps
    RM = bb * S_p        # activation rows per step
    RT = bb * T_p        # pooled rows per step

    # --- zero-padded operands (zero padding is exact; see kernel comments) -------
    x_p = jnp.pad(x, ((0, 0), (0, S_p - S), (0, D_in_p - D_in)))
    x_flat = x_p.reshape(B * S_p, D_in_p)

    w1_p = jnp.zeros((D_in_p, D_h_p), dtype=dtype).at[:D_in, :D_h].set(w1)
    w2_p = jnp.zeros((D_h_p, D_out_p), dtype=dtype).at[:D_h, :D_out].set(w2)
    b2_p = jnp.zeros((1, D_out_p), dtype=dtype).at[0, :D_out].set(b2)

    # Fold positional encoding + first bias into one hidden-space per-row bias:
    #   (x + pos) @ W1 + b1  ==  x @ W1 + (pos @ W1 + b1)
    # Rows >= min(S, len(pos)) get zero pos (just b1), matching the PyTorch slice.
    L_pos = pos_encoding.shape[0]
    m = min(S, L_pos)
    pos_eff = jnp.zeros((S_p, D_in), dtype=jnp.float32).at[:m, :].set(
        pos_encoding[:m, :].astype(jnp.float32))
    pos_hid = pos_eff @ w1.astype(jnp.float32) + b1.astype(jnp.float32)      # (S_p, D_h)
    posb = jnp.zeros((S_p, D_h_p), dtype=jnp.float32).at[:, :D_h].set(pos_hid)
    posb_tile = jnp.tile(posb, (bb, 1)).astype(dtype)                        # (RM, D_h_p)

    # Block-diagonal pooling matrix over the bb batch elements of one grid step.
    # Columns for padded seq rows and rows for padded target rows are zero, so
    # padding never leaks into real outputs.
    P = _adaptive_avg_pool_matrix(S, T)                                      # (T, S)
    P_bd = np.zeros((RT, RM), dtype=np.float32)
    for k in range(bb):
        P_bd[k * T_p:k * T_p + T, k * S_p:k * S_p + S] = P
    pool_mat = jnp.asarray(P_bd, dtype=jnp.float32)

    grid_spec = pltpu.PrefetchScalarGridSpec(
        num_scalar_prefetch=0,
        grid=(G,),
        in_specs=[
            pl.BlockSpec((RM, D_in_p), lambda i: (i, 0)),        # flattened activations
            pl.BlockSpec((RM, D_h_p), lambda i: (0, 0)),         # pos@W1 + b1 (grid-invariant)
            pl.BlockSpec((D_in_p, D_h_p), lambda i: (0, 0)),     # w1
            pl.BlockSpec((RT, RM), lambda i: (0, 0)),            # block-diag pool matrix
            pl.BlockSpec((D_h_p, D_out_p), lambda i: (0, 0)),    # w2
            pl.BlockSpec((1, D_out_p), lambda i: (0, 0)),        # b2
        ],
        out_specs=pl.BlockSpec((RT, D_out_p), lambda i: (i, 0)), # lane-dense output slab
    )

    out_flat = pl.pallas_call(
        _projector_kernel,
        out_shape=jax.ShapeDtypeStruct((B * T_p, D_out_p), dtype),
        grid_spec=grid_spec,
        compiler_params=pltpu.CompilerParams(dimension_semantics=("parallel",)),
    )(x_flat, posb_tile, w1_p, pool_mat, w2_p, b2_p)

    return out_flat.reshape(B, T_p, D_out_p)[:, :T, :D_out]


# ---------------------------------------------------------------------------
# Pure-JAX reference for verification (matches the PyTorch forward, eval mode)
# ---------------------------------------------------------------------------
def reference_forward(x, pos_encoding, w1, b1, w2, b2, target_length):
    B, S, D_in = x.shape
    m = min(S, pos_encoding.shape[0])
    x = x.at[:, :m, :].add(pos_encoding[None, :m, :])
    h = jnp.maximum(jnp.einsum("bsd,dh->bsh", x, w1) + b1, 0.0)
    y = jnp.einsum("bsh,ho->bso", h, w2) + b2
    P = jnp.asarray(_adaptive_avg_pool_matrix(S, target_length))
    return jnp.einsum("ts,bso->bto", P, y)


if __name__ == "__main__":
    # Small synthetic config:
    #   audio_hidden_dim = 32, lm_hidden_dim = 32
    #   audio_max_length = 16, audio_patch_size = 4      -> time_patches = 4
    #   audio_n_mels     = 8,  audio_freq_patch_size = 4 -> freq_patches = 2
    #   original_length  = 8,  audio_token_target_length = 4
    B = 2
    S = 8                 # seq_len == original_length
    D_in = 32             # audio_hidden_dim
    D_h = D_in // 2       # 16
    D_out = 32            # lm_hidden_dim
    T = 4                 # target_length
    ORIG_LEN = 8

    key = jax.random.PRNGKey(0)
    kx, kp, k1, kb1, k2, kb2 = jax.random.split(key, 6)

    x = jax.random.normal(kx, (B, S, D_in), dtype=jnp.float32)
    pos_encoding = 0.02 * jax.random.normal(kp, (ORIG_LEN, D_in), dtype=jnp.float32)
    w1 = jax.random.normal(k1, (D_in, D_h), dtype=jnp.float32) * (1.0 / np.sqrt(D_in))
    b1 = jax.random.normal(kb1, (D_h,), dtype=jnp.float32) * 0.01
    w2 = jax.random.normal(k2, (D_h, D_out), dtype=jnp.float32) * (1.0 / np.sqrt(D_h))
    b2 = jax.random.normal(kb2, (D_out,), dtype=jnp.float32) * 0.01

    out = audio_modality_projector(x, pos_encoding, w1, b1, w2, b2, T)
    out = jax.block_until_ready(out)

    ref = reference_forward(x, pos_encoding, w1, b1, w2, b2, T)
    assert out.shape == (B, T, D_out), out.shape
    assert jnp.allclose(out, ref, atol=1e-4, rtol=1e-5), "mismatch vs reference"

    print("KERNEL_OK")
</pallas_src>

<mosaic_0001>
module attributes {stable_mosaic.version = 11 : i64} {
  func.func @_projector_kernel(%arg0: i32, %arg1: memref<16x128xf32, #tpu.memory_space<vmem>>, %arg2: memref<16x128xf32, #tpu.memory_space<vmem>>, %arg3: memref<128x128xf32, #tpu.memory_space<vmem>>, %arg4: memref<16x16xf32, #tpu.memory_space<vmem>>, %arg5: memref<128x128xf32, #tpu.memory_space<vmem>>, %arg6: memref<1x128xf32, #tpu.memory_space<vmem>>, %arg7: memref<16x128xf32, #tpu.memory_space<vmem>>) attributes {dimension_semantics = [#tpu.dimension_semantics<parallel>], iteration_bounds = array<i64: 1>, scalar_prefetch = 0 : i64, scratch_operands = 0 : i64, tpu.core_type = #tpu.core_type<tc>, window_params = [{transform_indices = @transform_0, window_bounds = array<i64: 16, 128>}, {pipeline_mode = #tpu.pipeline_mode<synchronous>, transform_indices = @transform_1, window_bounds = array<i64: 16, 128>}, {pipeline_mode = #tpu.pipeline_mode<synchronous>, transform_indices = @transform_2, window_bounds = array<i64: 128, 128>}, {pipeline_mode = #tpu.pipeline_mode<synchronous>, transform_indices = @transform_3, window_bounds = array<i64: 16, 16>}, {pipeline_mode = #tpu.pipeline_mode<synchronous>, transform_indices = @transform_4, window_bounds = array<i64: 128, 128>}, {pipeline_mode = #tpu.pipeline_mode<synchronous>, transform_indices = @transform_5, window_bounds = array<i64: 1, 128>}, {transform_indices = @transform_6, window_bounds = array<i64: 16, 128>}]} {
    %c0 = arith.constant 0 : index
    %c0_0 = arith.constant 0 : index
    %0 = vector.load %arg1[%c0, %c0_0] : memref<16x128xf32, #tpu.memory_space<vmem>>, vector<16x128xf32>
    %c0_1 = arith.constant 0 : index
    %c0_2 = arith.constant 0 : index
    %1 = vector.load %arg3[%c0_1, %c0_2] : memref<128x128xf32, #tpu.memory_space<vmem>>, vector<128x128xf32>
    %cst = arith.constant dense<0.000000e+00> : vector<16x128xf32>
    %2 = tpu.matmul %0, %1, %cst {dimension_numbers = #tpu.dot_dimension_numbers<[1], [0], [0], [1], [0, 0, 1, 1], [], []>} : vector<16x128xf32>, vector<128x128xf32>, vector<16x128xf32> -> vector<16x128xf32>
    %c0_3 = arith.constant 0 : index
    %c0_4 = arith.constant 0 : index
    %3 = vector.load %arg2[%c0_3, %c0_4] : memref<16x128xf32, #tpu.memory_space<vmem>>, vector<16x128xf32>
    %4 = arith.addf %2, %3 : vector<16x128xf32>
    %cst_5 = arith.constant 0.000000e+00 : f32
    %5 = vector.broadcast %cst_5 : f32 to vector<16x128xf32>
    %6 = arith.maximumf %4, %5 : vector<16x128xf32>
    %c0_6 = arith.constant 0 : index
    %c0_7 = arith.constant 0 : index
    %7 = vector.load %arg4[%c0_6, %c0_7] : memref<16x16xf32, #tpu.memory_space<vmem>>, vector<16x16xf32>
    %cst_8 = arith.constant dense<0.000000e+00> : vector<16x128xf32>
    %8 = tpu.matmul %7, %6, %cst_8 {dimension_numbers = #tpu.dot_dimension_numbers<[1], [0], [0], [1], [0, 0, 1, 1], [], []>} : vector<16x16xf32>, vector<16x128xf32>, vector<16x128xf32> -> vector<16x128xf32>
    %c0_9 = arith.constant 0 : index
    %c0_10 = arith.constant 0 : index
    %9 = vector.load %arg5[%c0_9, %c0_10] : memref<128x128xf32, #tpu.memory_space<vmem>>, vector<128x128xf32>
    %cst_11 = arith.constant dense<0.000000e+00> : vector<16x128xf32>
    %10 = tpu.matmul %8, %9, %cst_11 {dimension_numbers = #tpu.dot_dimension_numbers<[1], [0], [0], [1], [0, 0, 1, 1], [], []>} : vector<16x128xf32>, vector<128x128xf32>, vector<16x128xf32> -> vector<16x128xf32>
    %c0_12 = arith.constant 0 : index
    %c0_13 = arith.constant 0 : index
    %11 = vector.load %arg6[%c0_12, %c0_13] : memref<1x128xf32, #tpu.memory_space<vmem>>, vector<1x128xf32>
    %12 = vector.broadcast %11 : vector<1x128xf32> to vector<16x128xf32>
    %13 = arith.addf %10, %12 : vector<16x128xf32>
    %c0_14 = arith.constant 0 : index
    %c0_15 = arith.constant 0 : index
    %14 = vector.load %arg7[%c0_14, %c0_15] : memref<16x128xf32, #tpu.memory_space<vmem>>, vector<16x128xf32>
    tpu.vector_store %arg7[%c0_14, %c0_15], %13 {strides = array<i32>} : memref<16x128xf32, #tpu.memory_space<vmem>>, vector<16x128xf32>,
    return
  }
  func.func @transform_0(%arg0: i32) -> (i32, i32) {
    %c0_i32 = arith.constant 0 : i32
    %c0_i32_0 = arith.constant 0 : i32
    return %arg0, %c0_i32 : i32, i32
  }
  func.func @transform_1(%arg0: i32) -> (i32, i32) {
    %c0_i32 = arith.constant 0 : i32
    %c0_i32_0 = arith.constant 0 : i32
    %c0_i32_1 = arith.constant 0 : i32
    return %c0_i32, %c0_i32_0 : i32, i32
  }
  func.func @transform_2(%arg0: i32) -> (i32, i32) {
    %c0_i32 = arith.constant 0 : i32
    %c0_i32_0 = arith.constant 0 : i32
    %c0_i32_1 = arith.constant 0 : i32
    return %c0_i32, %c0_i32_0 : i32, i32
  }
  func.func @transform_3(%arg0: i32) -> (i32, i32) {
    %c0_i32 = arith.constant 0 : i32
    %c0_i32_0 = arith.constant 0 : i32
    %c0_i32_1 = arith.constant 0 : i32
    return %c0_i32, %c0_i32_0 : i32, i32
  }
  func.func @transform_4(%arg0: i32) -> (i32, i32) {
    %c0_i32 = arith.constant 0 : i32
    %c0_i32_0 = arith.constant 0 : i32
    %c0_i32_1 = arith.constant 0 : i32
    return %c0_i32, %c0_i32_0 : i32, i32
  }
  func.func @transform_5(%arg0: i32) -> (i32, i32) {
    %c0_i32 = arith.constant 0 : i32
    %c0_i32_0 = arith.constant 0 : i32
    %c0_i32_1 = arith.constant 0 : i32
    return %c0_i32, %c0_i32_0 : i32, i32
  }
  func.func @transform_6(%arg0: i32) -> (i32, i32) {
    %c0_i32 = arith.constant 0 : i32
    %c0_i32_0 = arith.constant 0 : i32
    return %arg0, %c0_i32 : i32, i32
  }
}

</mosaic_0001>

<bundles_post_ra>
// kernel: tpu_custom_call.1
= control target key start
LH: loop header
LB: loop body
LE: loop exit
PB: predicated region body
PF: predicated region fallthrough
CT: control target
= control target key end

     0   :  { %11 = vsyncpa [#allocation3], 0  ;;  %s880_s0 = inlined_call_operand.hbm [shape: f32[16,128], index: 0, kind: input, shape index: {}]   ;;  %s881_s1 = inlined_call_operand.hbm [shape: f32[16,128], index: 1, kind: input, shape index: {}]   ;;  %s882_s2 = inlined_call_operand.hbm [shape: f32[128,128], index: 2, kind: input, shape index: {}]   ;;  %s883_s3 = inlined_call_operand.hbm [shape: f32[16,16], index: 3, kind: input, shape index: {}]   ;;  %s884_s4 = inlined_call_operand.hbm [shape: f32[128,128], index: 4, kind: input, shape index: {}]   ;;  %s885_s5 = inlined_call_operand.vmem [shape: f32[1,128], index: 5, kind: input, shape index: {}]   ;;  %s886_s6 = inlined_call_operand.hbm [shape: f32[16,128], index: 6, kind: output, shape index: {}]  }
   0x1   :  { %12 = vsyncpa [#allocation6], 0 }
   0x2   :  { %13 = vsyncpa [#allocation9], 0 }
   0x3   :  { %14 = vsyncpa [#allocation4], 0  ;;  %s728_s21 = smov [#allocation5]   ;;  %s729_s23 = smov [#allocation8]  }
   0x4   :  { %s32_s22 = sshll.u32 %s728_s21, 4  ;;  %s56_s24 = sshll.u32 %s729_s23, 4  ;;  %s33_s22 = int_to_ptr.vmem [resolvable:$true] %s32_s22  ;;  %s771_s24 = int_to_ptr.vmem [resolvable:$true] %s56_s24 }
   0x5   :  { %s588_s27 = scalar_lea.hbm %s881_s1, 256 }
   0x6   :  { %p589_p0 = scmp.ne.s32.totalorder %s881_s1, %s588_s27  ;;  %p592_p1 = scmp.lt.u32.totalorder %s588_s27, %s881_s1 }
   0x8   :  { %p594_p2 = pnand %p592_p1, %p589_p0 }
   0xa   :  { %597 = shalt.err (!%p594_p2)
}
   0xb   :  { %s598_s8 = scalar_lea.vmem %s33_s22, 256  ;;  %p603_p4 = scmp.lt.s32.totalorder %s33_s22, %s33_s22 }
   0xc   :  { %p599_p3 = scmp.ne.s32.totalorder %s33_s22, %s598_s8  ;;  %p604_p5 = scmp.lt.s32.totalorder %s598_s8, %s598_s8 }
   0xe   :  { %p605_p6 = por %p604_p5, %p603_p4 }
  0x10   :  { %p606_p7 = pnand %p605_p6, %p599_p3 }
  0x12   :  { %609 = shalt.err (!%p606_p7)
}
  0x13   :  { %s730_s9 = smov 128   ;;  %s731_s10 = smov 8  }
  0x14   :  { %38 = dma.hbm_to_vmem [thread:$0]  %s881_s1, 256, %s33_s22, [#allocation6], %s730_s9, %s730_s9, %s731_s10  }
  0x15   :  { %s610_s15 = scalar_lea.hbm %s883_s3, 256 }
  0x16   :  { %p611_p8 = scmp.ne.s32.totalorder %s883_s3, %s610_s15  ;;  %p614_p9 = scmp.lt.u32.totalorder %s610_s15, %s883_s3 }
  0x18   :  { %p616_p10 = pnand %p614_p9, %p611_p8 }
  0x1a   :  { %619 = shalt.err (!%p616_p10)
}
  0x1b   :  { %s620_s20 = scalar_lea.vmem %s771_s24, 256  ;;  %p625_p12 = scmp.lt.s32.totalorder %s771_s24, %s771_s24 }
  0x1c   :  { %p621_p11 = scmp.ne.s32.totalorder %s771_s24, %s620_s20  ;;  %p626_p13 = scmp.lt.s32.totalorder %s620_s20, %s620_s20 }
  0x1e   :  { %p627_p0 = por %p626_p13, %p625_p12 }
  0x20   :  { %p628_p1 = pnand %p627_p0, %p621_p11 }
  0x22   :  { %631 = shalt.err (!%p628_p1)
}
  0x23   :  { %62 = dma.hbm_to_vmem [thread:$0]  %s883_s3, 256, %s771_s24, [#allocation9], %s730_s9, %s730_s9, %s731_s10  }
  0x24   :  { %s732_s22 = smov [#allocation2]   ;;  %s733_s25 = smov [#allocation7]  }
  0x25   :  { %s20_s23 = sshll.u32 %s732_s22, 4  ;;  %s44_s26 = sshll.u32 %s733_s25, 4  ;;  %s21_s23 = int_to_ptr.vmem [resolvable:$true] %s20_s23  ;;  %s808_s26 = int_to_ptr.vmem [resolvable:$true] %s44_s26 }
  0x26   :  { %s632_s29 = scalar_lea.hbm %s880_s0, 256 }
  0x27   :  { %p633_p2 = scmp.ne.s32.totalorder %s880_s0, %s632_s29  ;;  %p636_p3 = scmp.lt.u32.totalorder %s632_s29, %s880_s0 }
  0x29   :  { %p638_p4 = pnand %p636_p3, %p633_p2 }
  0x2b   :  { %641 = shalt.err (!%p638_p4)
}
  0x2c   :  { %s642_s3 = scalar_lea.vmem %s21_s23, 256  ;;  %p647_p6 = scmp.lt.s32.totalorder %s21_s23, %s21_s23 }
  0x2d   :  { %p643_p5 = scmp.ne.s32.totalorder %s21_s23, %s642_s3  ;;  %p648_p7 = scmp.lt.s32.totalorder %s642_s3, %s642_s3 }
  0x2f   :  { %p649_p8 = por %p648_p7, %p647_p6 }
  0x31   :  { %p650_p9 = pnand %p649_p8, %p643_p5 }
  0x33   :  { %653 = shalt.err (!%p650_p9)
}
  0x34   :  { %26 = dma.hbm_to_vmem [thread:$0]  %s880_s0, 256, %s21_s23, [#allocation3], %s730_s9, %s730_s9, %s731_s10  }
  0x35   :  { %s654_s15 = scalar_lea.hbm %s882_s2, 2048 }
  0x36   :  { %p655_p10 = scmp.ne.s32.totalorder %s882_s2, %s654_s15  ;;  %p658_p11 = scmp.lt.u32.totalorder %s654_s15, %s882_s2 }
  0x38   :  { %p660_p12 = pnand %p658_p11, %p655_p10 }
  0x3a   :  { %663 = shalt.err (!%p660_p12)
}
  0x3b   :  { %s664_s20 = scalar_lea.vmem %s808_s26, 2048  ;;  %p669_p0 = scmp.lt.s32.totalorder %s808_s26, %s808_s26 }
  0x3c   :  { %p665_p13 = scmp.ne.s32.totalorder %s808_s26, %s664_s20  ;;  %p670_p1 = scmp.lt.s32.totalorder %s664_s20, %s664_s20 }
  0x3e   :  { %p671_p2 = por %p670_p1, %p669_p0 }
  0x40   :  { %p672_p3 = pnand %p671_p2, %p665_p13 }
  0x42   :  { %675 = shalt.err (!%p672_p3)
}
  0x43   :  { %50 = dma.hbm_to_vmem [thread:$0]  %s882_s2, 2048, %s808_s26, [#allocation6], %s730_s9, %s730_s9, %s731_s10  }
  0x44   :  { %s734_s21 = smov [#allocation10]   ;;  %s676_s27 = scalar_lea.hbm %s884_s4, 2048 }
  0x45   :  { %s68_s22 = sshll.u32 %s734_s21, 4  ;;  %p677_p4 = scmp.ne.s32.totalorder %s884_s4, %s676_s27  ;;  %s69_s22 = int_to_ptr.vmem [resolvable:$true] %s68_s22 }
  0x46   :  { %p680_p5 = scmp.lt.u32.totalorder %s676_s27, %s884_s4 }
  0x48   :  { %p682_p6 = pnand %p680_p5, %p677_p4 }
  0x4a   :  { %685 = shalt.err (!%p682_p6)
}
  0x4b   :  { %s686_s8 = scalar_lea.vmem %s69_s22, 2048  ;;  %p691_p8 = scmp.lt.s32.totalorder %s69_s22, %s69_s22 }
  0x4c   :  { %p687_p7 = scmp.ne.s32.totalorder %s69_s22, %s686_s8  ;;  %p692_p9 = scmp.lt.s32.totalorder %s686_s8, %s686_s8 }
  0x4e   :  { %p693_p10 = por %p692_p9, %p691_p8 }
  0x50   :  { %p694_p11 = pnand %p693_p10, %p687_p7 }
  0x52   :  { %697 = shalt.err (!%p694_p11)
}
  0x53   :  { %74 = dma.hbm_to_vmem [thread:$0]  %s884_s4, 2048, %s69_s22, [#allocation9], %s730_s9, %s730_s9, %s731_s10  }
  0x54   :  { %720 = dma.done.wait [#allocation3], 256  }
  0x55   :  { %721 = vsyncadd [#allocation3], 4294967040 }
  0x56   :  { %722 = dma.done.wait [#allocation6], 2304  }
  0x57   :  { %723 = vsyncadd [#allocation6], 4294964992 }
  0x58   :  { %724 = dma.done.wait [#allocation9], 2304  }
  0x59   :  { %725 = vsyncadd [#allocation9], 4294964992  ;;  %v94_v0 = vld [vmem:[#allocation7] sm:$0xff]  ;;  %v95_v1 = vld [vmem:[#allocation7 + $0x8] sm:$0xff]  ;;  %vm191_vm0 = vcmask 130048   ;;  %s735_s3 = smov [#allocation11]  }
  0x5a   :  { %v96_v2 = vld [vmem:[#allocation7 + $0x10] sm:$0xff]  ;;  %v512_v3 = vpack.c.bf16 %v95_v1, %v94_v0  ;;  %v97_v4 = vld [vmem:[#allocation7 + $0x18] sm:$0xff]  ;;  %v98_v6 = vld [vmem:[#allocation7 + $0x20] sm:$0xff]  ;;  %s378_s24 = sshll.u32 %s735_s3, 4  ;;  %s379_s24 = int_to_ptr.vmem [resolvable:$true] %s378_s24 }
  0x5b   :  { %v516_v5 = vpack.c.bf16 %v97_v4, %v96_v2  ;;  %v99_v7 = vld [vmem:[#allocation7 + $0x28] sm:$0xff]  ;;  %v92_v9 = vld [vmem:[#allocation2] sm:$0xff]  ;;  %v100_v10 = vld [vmem:[#allocation7 + $0x30] sm:$0xff]  ;;  %s698_s12 = scalar_lea.vmem %s379_s24, 256  ;;  %p703_p13 = scmp.lt.s32.totalorder %s379_s24, %s379_s24 }
  0x5c   :  { %513 = vmatprep.subr.bf16.mxu0 %v512_v3  ;;  %v520_v8 = vpack.c.bf16 %v99_v7, %v98_v6  ;;  %v101_v11 = vld [vmem:[#allocation7 + $0x38] sm:$0xff]  ;;  %467 = vmatprep.mubr.f32.mxu0 %v92_v9  ;;  %v102_v13 = vld [vmem:[#allocation7 + $0x40] sm:$0xff]  ;;  %v103_v14 = vld [vmem:[#allocation7 + $0x48] sm:$0xff]  ;;  %p699_p12 = scmp.ne.s32.totalorder %s379_s24, %s698_s12  ;;  %p704_p0 = scmp.lt.s32.totalorder %s698_s12, %s698_s12 }
  0x5d   :  { %515 = vmatpush3.bf16.msra.mxu0 %v512_v3  ;;  %v524_v12 = vpack.c.bf16 %v101_v11, %v100_v10  ;;  %v528_v15 = vpack.c.bf16 %v103_v14, %v102_v13  ;;  %v104_v16 = vld [vmem:[#allocation7 + $0x50] sm:$0xff]  ;;  %v105_v17 = vld [vmem:[#allocation7 + $0x58] sm:$0xff]  ;;  %v106_v19 = vld [vmem:[#allocation7 + $0x60] sm:$0xff] }
  0x5e   :  { %517 = vmatprep.subr.bf16.mxu0 %v516_v5  ;;  %v532_v18 = vpack.c.bf16 %v105_v17, %v104_v16  ;;  %v107_v20 = vld [vmem:[#allocation7 + $0x68] sm:$0xff]  ;;  %v108_v22 = vld [vmem:[#allocation7 + $0x70] sm:$0xff]  ;;  %v109_v23 = vld [vmem:[#allocation7 + $0x78] sm:$0xff]  ;;  %p705_p1 = por %p704_p0, %p703_p13 }
  0x5f   :  { %v536_v21 = vpack.c.bf16 %v107_v20, %v106_v19  ;;  %v540_v24 = vpack.c.bf16 %v109_v23, %v108_v22  ;;  %v93_v25 = vld [vmem:[#allocation2 + $0x8] sm:$0xff]  ;;  %v189_v26 = vld [vmem:[#allocation8] sm:$0xff]  ;;  %v111_v27 = vld [vmem:[#allocation5 + $0x8] sm:$0xff] }
  0x60   :  { %474 = vmatprep.mubr.msk.f32.mxu1 %vm191_vm0, %v189_v26  ;;  %v110_v28 = vld [vmem:[#allocation5] sm:$0xff]  ;;  %v274_v35 = vld [vmem:[#allocation10 + $0x8] sm:$0xff]  ;;  %v275_v39 = vld [vmem:[#allocation10 + $0x10] sm:$0xff]  ;;  %p706_p2 = pnand %p705_p1, %p699_p12 }
  0x61   :  { %519 = vmatpush3.bf16.msra.mxu0 %v516_v5  ;;  %v273_v34 = vld [vmem:[#allocation10] sm:$0xff]  ;;  %v276_v40 = vld [vmem:[#allocation10 + $0x18] sm:$0xff]  ;;  %v278_v44 = vld [vmem:[#allocation10 + $0x28] sm:$0xff] }
  0x62   :  { %521 = vmatprep.subr.bf16.mxu0 %v520_v8  ;;  %v548_v38 = vpack.c.bf16 %v274_v35, %v273_v34  ;;  %v190_v41 = vld [vmem:[#allocation8 + $0x8] sm:$0xff]  ;;  %v552_v42 = vpack.c.bf16 %v276_v40, %v275_v39  ;;  %v277_v43 = vld [vmem:[#allocation10 + $0x20] sm:$0xff]  ;;  %v279_v46 = vld [vmem:[#allocation10 + $0x30] sm:$0xff] }
  0x63   :  { %v556_v45 = vpack.c.bf16 %v278_v44, %v277_v43  ;;  %v280_v47 = vld [vmem:[#allocation10 + $0x38] sm:$0xff]  ;;  %v281_v49 = vld [vmem:[#allocation10 + $0x40] sm:$0xff]  ;;  %v282_v50 = vld [vmem:[#allocation10 + $0x48] sm:$0xff] }
  0x64   :  { %v560_v48 = vpack.c.bf16 %v280_v47, %v279_v46  ;;  %v564_v51 = vpack.c.bf16 %v282_v50, %v281_v49  ;;  %v283_v52 = vld [vmem:[#allocation10 + $0x50] sm:$0xff]  ;;  %v284_v53 = vld [vmem:[#allocation10 + $0x58] sm:$0xff]  ;;  %v285_v55 = vld [vmem:[#allocation10 + $0x60] sm:$0xff] }
  0x65   :  { %523 = vmatpush3.bf16.msra.mxu0 %v520_v8  ;;  %v568_v54 = vpack.c.bf16 %v284_v53, %v283_v52  ;;  %v286_v56 = vld [vmem:[#allocation10 + $0x68] sm:$0xff]  ;;  %v287_v58 = vld [vmem:[#allocation10 + $0x70] sm:$0xff]  ;;  %v288_v59 = vld [vmem:[#allocation10 + $0x78] sm:$0xff] }
  0x66   :  { %525 = vmatprep.subr.bf16.mxu0 %v524_v12  ;;  %v572_v57 = vpack.c.bf16 %v286_v56, %v285_v55  ;;  %v576_v60 = vpack.c.bf16 %v288_v59, %v287_v58  ;;  %v394_v63 = vld [vmem:[%s885_s5] ss:$0 sm:$0xff] }
  0x69   :  { %527 = vmatpush3.bf16.msra.mxu0 %v524_v12 }
  0x6a   :  { %529 = vmatprep.subr.bf16.mxu0 %v528_v15 }
  0x6d   :  { %531 = vmatpush3.bf16.msra.mxu0 %v528_v15 }
  0x6e   :  { %533 = vmatprep.subr.bf16.mxu0 %v532_v18 }
  0x71   :  { %535 = vmatpush3.bf16.msra.mxu0 %v532_v18 }
  0x72   :  { %537 = vmatprep.subr.bf16.mxu0 %v536_v21 }
  0x75   :  { %539 = vmatpush3.bf16.msra.mxu0 %v536_v21 }
  0x76   :  { %541 = vmatprep.subr.bf16.mxu0 %v540_v24 }
  0x79   :  { %543 = vmatpush3.bf16.msra.mxu0 %v540_v24 }
  0x7c   :  { %468 = vmatmul.mubr.f32.vlgmr.msra.gmra.mrb[0].mxu0 %v93_v25 }
 0x14f   :  { %v469_v29 = vpop.f32.mrb[0].mxu0 }
 0x150   :  { %v184_v30 = vadd.f32 %v469_v29, %v111_v27  ;;  %v178_v31 = vpop.f32.mrb[1].mxu0 }
 0x151   :  { %v179_v32 = vadd.f32 %v178_v31, %v110_v28 }
 0x152   :  { %v188_v33 = vmax.f32 %v184_v30, 0.0 }
 0x153   :  { %v187_v36 = vmax.f32 %v179_v32, 0.0 }
 0x155   :  { %v544_v37 = vpack.c.bf16 %v188_v33, %v187_v36 }
 0x157   :  { %545 = vmatprep.subr.bf16.mxu1 %v544_v37 }
 0x158   :  { %547 = vmatpush3.bf16.msra.mxu1 %v544_v37 }
 0x159   :  { %549 = vmatprep.subr.bf16.mxu1 %v548_v38 }
 0x15b   :  { %475 = vmatmul.mubr.msk.f32.vlgmr.msra.gmra.mrb[0].mxu1 %vm191_vm0, %v190_v41 }
 0x15c   :  { %551 = vmatpush3.bf16.msra.mxu1 %v548_v38 }
 0x15d   :  { %553 = vmatprep.subr.bf16.mxu1 %v552_v42 }
 0x160   :  { %555 = vmatpush3.bf16.msra.mxu1 %v552_v42 }
 0x161   :  { %557 = vmatprep.subr.bf16.mxu1 %v556_v45 }
 0x164   :  { %559 = vmatpush3.bf16.msra.mxu1 %v556_v45 }
 0x165   :  { %561 = vmatprep.subr.bf16.mxu1 %v560_v48 }
 0x168   :  { %563 = vmatpush3.bf16.msra.mxu1 %v560_v48 }
 0x169   :  { %565 = vmatprep.subr.bf16.mxu1 %v564_v51 }
 0x16c   :  { %567 = vmatpush3.bf16.msra.mxu1 %v564_v51 }
 0x16d   :  { %569 = vmatprep.subr.bf16.mxu1 %v568_v54 }
 0x170   :  { %571 = vmatpush3.bf16.msra.mxu1 %v568_v54 }
 0x171   :  { %573 = vmatprep.subr.bf16.mxu1 %v572_v57 }
 0x174   :  { %575 = vmatpush3.bf16.msra.mxu1 %v572_v57 }
 0x175   :  { %577 = vmatprep.subr.bf16.mxu1 %v576_v60 }
 0x178   :  { %579 = vmatpush3.bf16.msra.mxu1 %v576_v60 }
 0x22e   :  { %v476_v61 = vpop.f32.mrb[0].mxu1 }
 0x22f   :  { %v264_v62 = vpop.f32.mrb[1].mxu1 }
 0x230   :  { %509 = vmatprep.mubr.f32.mxu1 %v264_v62 }
 0x231   :  { %510 = vmatmul.mubr.f32.vlgmr.msra.gmra.mrb[2].mxu1 %v476_v61 }
 0x304   :  { %v511_v0 = vpop.f32.mrb[2].mxu1 }
 0x305   :  { %v368_v1 = vadd.f32 %v511_v0, %v394_v63  ;;  %v362_v2 = vpop.f32.mrb[3].mxu1 }
 0x306   :  { %v363_v3 = vadd.f32 %v394_v63, %v362_v2 }
 0x307   :  { %372 = vst [vmem:[#allocation11 + $0x8] sm:$0xff] %v368_v1 }
 0x308   :  { %371 = vst [vmem:[#allocation11] sm:$0xff] %v363_v3 }
 0x309   :  { %709 = shalt.err (!%p706_p2)
}
 0x30a   :  { %s710_s5 = scalar_lea.hbm %s886_s6, 256 }
 0x30b   :  { %p711_p3 = scmp.ne.s32.totalorder %s886_s6, %s710_s5  ;;  %p714_p4 = scmp.lt.u32.totalorder %s710_s5, %s886_s6 }
 0x30d   :  { %p716_p5 = pnand %p714_p4, %p711_p3 }
 0x30f   :  { %719 = shalt.err (!%p716_p5)
}
 0x310   :  { %384 = dma.vmem_to_hbm [thread:$0]  %s379_s24, 256, %s886_s6, [#allocation4], %s730_s9, %s730_s9, %s731_s10  }
 0x311   :  { %726 = dma.done.wait [#allocation4], 256  }
 0x312   :  { %727 = vsyncadd [#allocation4], 4294967040 }
 0x313   :  { %388 = vsyncpa [#allocation3], 1 }
 0x314   :  { %389 = vsyncpa [#allocation6], 1 }
 0x315   :  { %390 = vsyncpa [#allocation9], 1 }
 0x316   :  { %391 = vsyncpa [#allocation4], 1 }

</bundles_post_ra>
